<compile_context>
chip_gen: v7x
topology: tpu7x:2x2x1
jax: 0.10.0
libtpu: 0.0.40
codegen_flags: <defaults>
</compile_context>

<pallas_src>
import functools

import jax
import jax.numpy as jnp
from jax import lax
from jax.experimental import pallas as pl
from jax.experimental.pallas import tpu as pltpu

LAMBDA_A = 0.5          # config.lambda_a default
USE_MAMC = True         # config.use_mamc default
LABEL_SMOOTH = 0.1      # nn.CrossEntropyLoss(label_smoothing=0.1)


def _ceil_to(x, m):
    return ((x + m - 1) // m) * m


def _pick_tile(n_rows, max_tile):
    """Row-tile size: multiple of 8, <= max_tile, and (when possible without going
    below 8 rows) giving >= 2 grid steps so the 'parallel' axis spans both v7x TCs."""
    n8 = _ceil_to(max(n_rows, 1), 8)
    t = min(max_tile, n8)
    while t > 8 and _ceil_to(n_rows, t) // t < 2:
        t = _ceil_to(max(t // 2, 8), 8)
    return t


def _vmem_limit_bytes():
    """48 MiB on v7x (64 MiB/core), 96 MiB on v5e/v6e (128 MiB)."""
    try:
        cap = pltpu.get_tpu_info().vmem_capacity_bytes
    except Exception:
        cap = 64 * 1024 * 1024
    return int(min(cap * 3 // 4, 96 * 1024 * 1024))


# --------------------------------------------------------------------------- #
# Kernel 1: cross-entropy with label smoothing (tiled over batch rows)         #
# --------------------------------------------------------------------------- #
def _ce_kernel(pred_ref, tgt_ref, out_ref, *, num_classes, batch_real):
    # pred_ref: (TB, C) f32 logits (padded rows are zeros)
    # tgt_ref:  (TB, 1) int32 targets (-1 on padded rows)
    # out_ref:  (1, 8, 128) f32 per-tile partial of the mean smoothed CE
    logits = pred_ref[...]
    tgt = tgt_ref[...]
    tb, c = logits.shape

    m = jnp.max(logits, axis=1, keepdims=True)
    lse = jnp.log(jnp.sum(jnp.exp(logits - m), axis=1, keepdims=True)) + m

    # picked log-prob and summed log-prob derived from raw logits (no (TB,C) logp array)
    col = lax.broadcasted_iota(jnp.int32, (tb, c), 1)
    picked_logit = jnp.sum(jnp.where(col == tgt, logits, 0.0), axis=1, keepdims=True)
    sum_logits = jnp.sum(logits, axis=1, keepdims=True)
    picked_logp = picked_logit - lse                              # logp[i, t_i]
    sum_logp = sum_logits - num_classes * lse                     # sum_j logp[i, j]

    valid = (tgt >= 0).astype(jnp.float32)                        # 0 on padded rows
    eps = LABEL_SMOOTH
    per_row = -((1.0 - eps) * picked_logp + (eps / num_classes) * sum_logp)
    partial = jnp.sum(per_row * valid) / batch_real
    out_ref[...] = jnp.zeros((1, 8, 128), jnp.float32) + partial


def ce_loss_pallas(pred, targets):
    b, c = pred.shape
    tb = _pick_tile(b, 256)
    b_pad = _ceil_to(b, tb)
    grid = b_pad // tb

    pred_p = jnp.pad(pred.astype(jnp.float32), ((0, b_pad - b), (0, 0)))
    tgt_p = jnp.pad(targets.astype(jnp.int32).reshape(b, 1),
                    ((0, b_pad - b), (0, 0)), constant_values=-1)

    kernel = functools.partial(_ce_kernel, num_classes=c, batch_real=b)
    out = pl.pallas_call(
        kernel,
        out_shape=jax.ShapeDtypeStruct((grid, 8, 128), jnp.float32),
        grid=(grid,),
        in_specs=[pl.BlockSpec((tb, c), lambda i: (i, 0)),
                  pl.BlockSpec((tb, 1), lambda i: (i, 0))],
        out_specs=pl.BlockSpec((1, 8, 128), lambda i: (i, 0, 0)),
        compiler_params=pltpu.CompilerParams(
            dimension_semantics=("parallel",),
            vmem_limit_bytes=_vmem_limit_bytes()),
    )(pred_p, tgt_p)
    return jnp.sum(out[:, 0, 0])


# --------------------------------------------------------------------------- #
# Kernel 2: N-pairs loss (MAMC eq. 11), tiled over Gram rows                   #
# --------------------------------------------------------------------------- #
def _npairs_kernel(xr_ref, xt_ref, lab_r_ref, par_r_ref, lab_c_ref, par_c_ref,
                   out_ref, *, n_real):
    # xr_ref:    (TM, Dp) f32 pre-normalized row-tile features
    # xt_ref:    (Dp, Np) f32 pre-normalized, pre-transposed full features (constant block)
    # lab_r/par_r: (TM, 1) int32 labels/parts of the row tile (pad sentinel -1)
    # lab_c/par_c: (1, Np) int32 labels/parts of all columns (pad sentinel -2)
    # out_ref:   (1, 8, 128) f32 per-tile partial (unnormalized) loss
    xr = xr_ref[...]
    xt = xt_ref[...]

    # Gram row-tile on the MXU in natural [M,K]x[K,N] layout.
    prod = lax.dot_general(xr, xt, (((1,), (0,)), ((), ())),
                           preferred_element_type=jnp.float32)    # (TM, Np)
    tm, np_ = prod.shape

    # Boolean masks built in-kernel from O(N) label / part vectors (no f32 mask arrays).
    same_class = lab_r_ref[...] == lab_c_ref[...]                 # (TM,1)==(1,Np) -> (TM,Np)
    same_part = par_r_ref[...] == par_c_ref[...]
    sasc = jnp.logical_and(same_class, same_part)
    contrib = jnp.logical_or(same_class, same_part)               # sasc | sadc | dasc
    dadc = jnp.logical_and(jnp.logical_not(same_class),
                           jnp.logical_not(same_part))

    e = jnp.exp(prod)                                             # single N^2 exp

    if np_ > n_real:   # static branch: padded columns must not feed the negative sums
        col_valid = lax.broadcasted_iota(jnp.int32, (tm, np_), 1) < n_real
        dadc = jnp.logical_and(dadc, col_valid)
        s_all = jnp.sum(jnp.where(col_valid, e, 0.0), axis=1, keepdims=True)
    else:
        s_all = jnp.sum(e, axis=1, keepdims=True)

    s_sasc = jnp.sum(jnp.where(sasc, e, 0.0), axis=1, keepdims=True)
    s_dadc = jnp.sum(jnp.where(dadc, e, 0.0), axis=1, keepdims=True)
    s_neg_all = s_all - s_sasc                                    # sadc|dasc|dadc negatives

    # Merged log term (exact: sasc and sadc|dasc are disjoint):
    #   log(1 + exp(-prod) * S) == log(e + S) - prod, with S selected per element.
    denom = jnp.where(sasc, s_neg_all, s_dadc)                    # broadcast (TM,1)->(TM,Np)
    t = jnp.log(e + denom) - prod                                 # single N^2 log
    partial = jnp.sum(jnp.where(contrib, t, 0.0))
    out_ref[...] = jnp.zeros((1, 8, 128), jnp.float32) + partial


def npairs_loss_pallas(x_part, targets):
    b, p, d = x_part.shape
    n = b * p
    x = x_part.reshape(n, d).astype(jnp.float32)

    # F.normalize(p=2, dim=1) done ONCE here (not per grid step in the kernel).
    norm = jnp.sqrt(jnp.sum(x * x, axis=1, keepdims=True))
    xn = x / jnp.maximum(norm, 1e-12)

    dp = _ceil_to(d, 128)                       # lane-dense feature dim (zero pad is free)
    tm_cap = 128 if n >= 2048 else 256          # smaller tiles for large N (v7x VMEM)
    tm = _pick_tile(n, tm_cap)
    n_pad = _ceil_to(n, tm)
    grid = n_pad // tm

    xn_p = jnp.pad(xn, ((0, n_pad - n), (0, dp - d)))             # (n_pad, dp) rows
    xt = xn_p.T                                                   # (dp, n_pad) columns (constant block)

    labels = jnp.repeat(targets.astype(jnp.int32), p)             # repeat_interleave
    parts = jnp.tile(jnp.arange(p, dtype=jnp.int32), b)           # arange(p).repeat(b)
    # Row / column copies use DIFFERENT pad sentinels so padded rows never pair with anything.
    lab_r = jnp.pad(labels, (0, n_pad - n), constant_values=-1).reshape(n_pad, 1)
    par_r = jnp.pad(parts, (0, n_pad - n), constant_values=-1).reshape(n_pad, 1)
    lab_c = jnp.pad(labels, (0, n_pad - n), constant_values=-2).reshape(1, n_pad)
    par_c = jnp.pad(parts, (0, n_pad - n), constant_values=-2).reshape(1, n_pad)

    kernel = functools.partial(_npairs_kernel, n_real=n)
    out = pl.pallas_call(
        kernel,
        out_shape=jax.ShapeDtypeStruct((grid, 8, 128), jnp.float32),
        grid=(grid,),
        in_specs=[pl.BlockSpec((tm, dp), lambda i: (i, 0)),       # row tile of normalized x
                  pl.BlockSpec((dp, n_pad), lambda i: (0, 0)),    # full x^T, constant block
                  pl.BlockSpec((tm, 1), lambda i: (i, 0)),
                  pl.BlockSpec((tm, 1), lambda i: (i, 0)),
                  pl.BlockSpec((1, n_pad), lambda i: (0, 0)),
                  pl.BlockSpec((1, n_pad), lambda i: (0, 0))],
        out_specs=pl.BlockSpec((1, 8, 128), lambda i: (i, 0, 0)),
        compiler_params=pltpu.CompilerParams(
            dimension_semantics=("parallel",),
            vmem_limit_bytes=_vmem_limit_bytes()),
    )(xn_p, xt, lab_r, par_r, lab_c, par_c)
    return jnp.sum(out[:, 0, 0]) / n


# --------------------------------------------------------------------------- #
# MAMCLoss forward                                                             #
# --------------------------------------------------------------------------- #
def mamc_loss(pred, x_part, targets, lambda_a=LAMBDA_A, use_mamc=USE_MAMC):
    loss_ce = ce_loss_pallas(pred, targets)
    if not use_mamc:
        return loss_ce
    loss_npair = npairs_loss_pallas(x_part, targets)
    return loss_ce + lambda_a * loss_npair


# --------------------------------------------------------------------------- #
# Pure-JAX reference (original formulation, for a sanity check)                #
# --------------------------------------------------------------------------- #
def _build_masks_ref(targets, b, p):
    labels = jnp.repeat(targets.astype(jnp.int32), p)
    parts = jnp.tile(jnp.arange(p, dtype=jnp.int32), b)
    same_class = labels[:, None] == labels[None, :]
    same_part = parts[:, None] == parts[None, :]
    m_sasc = (same_class & same_part).astype(jnp.float32)
    m_sadc = ((~same_class) & same_part).astype(jnp.float32)
    m_dasc = (same_class & (~same_part)).astype(jnp.float32)
    m_dadc = ((~same_class) & (~same_part)).astype(jnp.float32)
    return m_sasc, m_sadc, m_dasc, m_dadc


def mamc_loss_ref(pred, x_part, targets, lambda_a=LAMBDA_A):
    b, c = pred.shape
    logp = jax.nn.log_softmax(pred.astype(jnp.float32), axis=1)
    q = (1.0 - LABEL_SMOOTH) * jax.nn.one_hot(targets, c) + LABEL_SMOOTH / c
    loss_ce = -jnp.mean(jnp.sum(q * logp, axis=1))

    bb, p, d = x_part.shape
    n = bb * p
    x = x_part.reshape(n, d).astype(jnp.float32)
    xn = x / jnp.maximum(jnp.linalg.norm(x, axis=1, keepdims=True), 1e-12)
    prod = lax.dot_general(xn, xn, (((1,), (1,)), ((), ())),
                           precision=lax.Precision.HIGHEST)
    m_sasc, m_sadc, m_dasc, m_dadc = _build_masks_ref(targets, bb, p)
    e = jnp.exp(prod)
    inv_e = jnp.exp(-prod)
    s_not_sasc = jnp.sum(e * (1.0 - m_sasc), axis=1, keepdims=True)
    s_dadc = jnp.sum(e * m_dadc, axis=1, keepdims=True)
    l = (jnp.sum(m_sasc * jnp.log(1.0 + inv_e * s_not_sasc))
         + jnp.sum(m_sadc * jnp.log(1.0 + inv_e * s_dadc))
         + jnp.sum(m_dasc * jnp.log(1.0 + inv_e * s_dadc)))
    return loss_ce + lambda_a * (l / n)


if __name__ == "__main__":
    key = jax.random.PRNGKey(0)
    k1, k2, k3, k4, k5, k6 = jax.random.split(key, 6)

    # Case 1: N = B*P multiple of the row tile (no padded-column path).
    B, P, D, C = 2, 4, 32, 4          # batch, parts, feat_dim, num_classes
    pred = jax.random.normal(k1, (B, C), dtype=jnp.float32)
    x_part = jax.random.normal(k2, (B, P, D), dtype=jnp.float32)
    targets = jax.random.randint(k3, (B,), 0, C, dtype=jnp.int32)

    loss = jax.block_until_ready(mamc_loss(pred, x_part, targets))
    ref = jax.block_until_ready(mamc_loss_ref(pred, x_part, targets))
    assert jnp.isfinite(loss), "non-finite loss"
    assert jnp.allclose(loss, ref, rtol=1e-3, atol=1e-3), (loss, ref)

    # Case 2: N = 9 -> exercises the padded-column (col_valid) path and a 2-step grid.
    B2, P2, D2, C2 = 3, 3, 24, 5
    pred2 = jax.random.normal(k4, (B2, C2), dtype=jnp.float32)
    x_part2 = jax.random.normal(k5, (B2, P2, D2), dtype=jnp.float32)
    targets2 = jax.random.randint(k6, (B2,), 0, C2, dtype=jnp.int32)

    loss2 = jax.block_until_ready(mamc_loss(pred2, x_part2, targets2))
    ref2 = jax.block_until_ready(mamc_loss_ref(pred2, x_part2, targets2))
    assert jnp.isfinite(loss2), "non-finite loss (case 2)"
    assert jnp.allclose(loss2, ref2, rtol=1e-3, atol=1e-3), (loss2, ref2)

    print("KERNEL_OK")
</pallas_src>

<mosaic_0001>
module attributes {stable_mosaic.version = 11 : i64} {
  func.func @_ce_kernel(%arg0: i32, %arg1: memref<8x4xf32, #tpu.memory_space<vmem>>, %arg2: memref<8x1xi32, #tpu.memory_space<vmem>>, %arg3: memref<1x8x128xf32, #tpu.memory_space<vmem>>) attributes {dimension_semantics = [#tpu.dimension_semantics<parallel>], iteration_bounds = array<i64: 1>, scalar_prefetch = 0 : i64, scratch_operands = 0 : i64, tpu.core_type = #tpu.core_type<tc>, window_params = [{transform_indices = @transform_0, window_bounds = array<i64: 8, 4>}, {transform_indices = @transform_1, window_bounds = array<i64: 8, 1>}, {transform_indices = @transform_2, window_bounds = array<i64: 1, 8, 128>}]} {
    %c0 = arith.constant 0 : index
    %c0_0 = arith.constant 0 : index
    %0 = vector.load %arg1[%c0, %c0_0] : memref<8x4xf32, #tpu.memory_space<vmem>>, vector<8x4xf32>
    %c0_1 = arith.constant 0 : index
    %c0_2 = arith.constant 0 : index
    %1 = vector.load %arg2[%c0_1, %c0_2] : memref<8x1xi32, #tpu.memory_space<vmem>>, vector<8x1xi32>
    %cst = arith.constant dense<0xFF800000> : vector<8xf32>
    %2 = vector.multi_reduction <maximumf>, %0, %cst [1] : vector<8x4xf32> to vector<8xf32>
    %3 = vector.shape_cast %2 : vector<8xf32> to vector<8x1xf32>
    %4 = vector.broadcast %3 : vector<8x1xf32> to vector<8x4xf32>
    %5 = arith.subf %0, %4 : vector<8x4xf32>
    %6 = math.exp %5 : vector<8x4xf32>
    %cst_3 = arith.constant dense<0.000000e+00> : vector<8xf32>
    %7 = vector.multi_reduction <add>, %6, %cst_3 [1] : vector<8x4xf32> to vector<8xf32>
    %8 = vector.shape_cast %7 : vector<8xf32> to vector<8x1xf32>
    %9 = math.log %8 : vector<8x1xf32>
    %10 = arith.addf %9, %3 : vector<8x1xf32>
    %11 = tpu.iota {dimensions = array<i32: 1>} : vector<8x4xi32>
    %12 = vector.broadcast %1 : vector<8x1xi32> to vector<8x4xi32>
    %13 = arith.cmpi eq, %11, %12 : vector<8x4xi32>
    %cst_4 = arith.constant 0.000000e+00 : f32
    %14 = vector.broadcast %cst_4 : f32 to vector<8x4xf32>
    %15 = arith.select %13, %0, %14 : vector<8x4xi1>, vector<8x4xf32>
    %cst_5 = arith.constant dense<0.000000e+00> : vector<8xf32>
    %16 = vector.multi_reduction <add>, %15, %cst_5 [1] : vector<8x4xf32> to vector<8xf32>
    %17 = vector.shape_cast %16 : vector<8xf32> to vector<8x1xf32>
    %cst_6 = arith.constant dense<0.000000e+00> : vector<8xf32>
    %18 = vector.multi_reduction <add>, %0, %cst_6 [1] : vector<8x4xf32> to vector<8xf32>
    %19 = vector.shape_cast %18 : vector<8xf32> to vector<8x1xf32>
    %20 = arith.subf %17, %10 : vector<8x1xf32>
    %cst_7 = arith.constant 4.000000e+00 : f32
    %21 = vector.broadcast %cst_7 : f32 to vector<8x1xf32>
    %22 = arith.mulf %21, %10 : vector<8x1xf32>
    %23 = arith.subf %19, %22 : vector<8x1xf32>
    %c0_i32 = arith.constant 0 : i32
    %24 = vector.broadcast %c0_i32 : i32 to vector<8x1xi32>
    %25 = arith.cmpi sge, %1, %24 : vector<8x1xi32>
    %26 = arith.extui %25 : vector<8x1xi1> to vector<8x1xi32>
    %27 = arith.sitofp %26 : vector<8x1xi32> to vector<8x1xf32>
    %cst_8 = arith.constant 0.899999976 : f32
    %28 = vector.broadcast %cst_8 : f32 to vector<8x1xf32>
    %29 = arith.mulf %28, %20 : vector<8x1xf32>
    %cst_9 = arith.constant 2.500000e-02 : f32
    %30 = vector.broadcast %cst_9 : f32 to vector<8x1xf32>
    %31 = arith.mulf %30, %23 : vector<8x1xf32>
    %32 = arith.addf %29, %31 : vector<8x1xf32>
    %cst_10 = arith.constant 0.000000e+00 : f32
    %33 = vector.broadcast %cst_10 : f32 to vector<8x1xf32>
    %34 = arith.subf %33, %32 : vector<8x1xf32>
    %35 = arith.mulf %34, %27 : vector<8x1xf32>
    %36 = vector.shape_cast %35 : vector<8x1xf32> to vector<1x8x1xf32>
    %cst_11 = arith.constant dense<0.000000e+00> : vector<1xf32>
    %37 = vector.multi_reduction <add>, %36, %cst_11 [1, 2] : vector<1x8x1xf32> to vector<1xf32>
    %38 = vector.shape_cast %37 : vector<1xf32> to vector<1x1x1xf32>
    %39 = vector.extract %38[0, 0, 0] : f32 from vector<1x1x1xf32>
    %cst_12 = arith.constant 2.000000e+00 : f32
    %40 = arith.divf %39, %cst_12 : f32
    %cst_13 = arith.constant 0.000000e+00 : f32
    %41 = vector.broadcast %cst_13 : f32 to vector<1x8x128xf32>
    %42 = vector.broadcast %40 : f32 to vector<1x8x128xf32>
    %43 = arith.addf %41, %42 : vector<1x8x128xf32>
    %c0_14 = arith.constant 0 : index
    %c0_15 = arith.constant 0 : index
    %c0_16 = arith.constant 0 : index
    %44 = vector.load %arg3[%c0_14, %c0_15, %c0_16] : memref<1x8x128xf32, #tpu.memory_space<vmem>>, vector<1x8x128xf32>
    tpu.vector_store %arg3[%c0_14, %c0_15, %c0_16], %43 {strides = array<i32>} : memref<1x8x128xf32, #tpu.memory_space<vmem>>, vector<1x8x128xf32>,
    return
  }
  func.func @transform_0(%arg0: i32) -> (i32, i32) {
    %c0_i32 = arith.constant 0 : i32
    %c0_i32_0 = arith.constant 0 : i32
    return %arg0, %c0_i32 : i32, i32
  }
  func.func @transform_1(%arg0: i32) -> (i32, i32) {
    %c0_i32 = arith.constant 0 : i32
    %c0_i32_0 = arith.constant 0 : i32
    return %arg0, %c0_i32 : i32, i32
  }
  func.func @transform_2(%arg0: i32) -> (i32, i32, i32) {
    %c0_i32 = arith.constant 0 : i32
    %c0_i32_0 = arith.constant 0 : i32
    %c0_i32_1 = arith.constant 0 : i32
    return %arg0, %c0_i32, %c0_i32_0 : i32, i32, i32
  }
}

</mosaic_0001>

<bundles_post_ra>
// kernel: tpu_custom_call.1
= control target key start
LH: loop header
LB: loop body
LE: loop exit
PB: predicated region body
PF: predicated region fallthrough
CT: control target
= control target key end

     0   :  { %vm14_vm0 = vcmask 31744   ;;  %s157_s0 = inlined_call_operand.vmem [shape: f32[8,4], index: 0, kind: input, shape index: {}]   ;;  %s158_s1 = inlined_call_operand.vmem [shape: s32[8,1], index: 1, kind: input, shape index: {}]   ;;  %s159_s2 = inlined_call_operand.hbm [shape: f32[1,8,128], index: 2, kind: output, shape index: {}]  }
   0x1   :  { %v12_v0 = vld [vmem:[%s157_s0] sm:$0xff] }
   0x2   :  { %7 = vsyncpa [#allocation3], 0  ;;  %v15_v1 = vsel %vm14_vm0, %v12_v0, -inf  ;;  %v117_v2 = vmov 0   ;;  %v13_v3 = vld [vmem:[%s158_s1] sm:$0xff]  ;;  %v27_v7 = vlaneseq  ;;  %v37_v14 = vsel %vm14_vm0, %v12_v0, 0.0 }
   0x3   :  { %88 = vset.pattern.permute.xlu0 %v117_v2  ;;  %vm43_vm2 = vcmp.ge.s32.totalorder %v13_v3, 0  ;;  %v118_v27 = vmov 0.0   ;;  %vm51_vm3 = vcmask 7168   ;;  %s119_s0 = smov [#allocation2]  }
   0x4   :  { %16 = vmax.xlane.f32.xlu0 %v15_v1  ;;  %v28_v8 = vand.u32 127, %v27_v7  ;;  %v82_v28 = vsel %vm43_vm2, 1.0, %v118_v27  ;;  %s74_s1 = sshll.u32 %s119_s0, 4  ;;  %s75_s1 = int_to_ptr.vmem [resolvable:$true] %s74_s1 }
   0x5   :  { %s93_s15 = scalar_lea.vmem %s75_s1, 128  ;;  %p98_p1 = scmp.lt.s32.totalorder %s75_s1, %s75_s1 }
   0x6   :  { %p94_p0 = scmp.ne.s32.totalorder %s75_s1, %s93_s15  ;;  %p99_p2 = scmp.lt.s32.totalorder %s93_s15, %s93_s15 }
   0x8   :  { %p100_p3 = por %p99_p2, %p98_p1 }
   0xa   :  { %p101_p4 = pnand %p100_p3, %p94_p0 }
  0x1a   :  { %30 = vperm.xlu0 %88, %v13_v3  }
  0x91   :  { %v17_v4 = vpop.xlane.xlu0 %16 }
  0x92   :  { %v18_v5 = vsub.f32 %v12_v0, %v17_v4 }
  0x94   :  { %v19_v6 = vmul.f32 1.442695, %v18_v5 }
  0x96   :  { %89 = vpow2.f32 %v19_v6 }
  0x99   :  { %v31_v9 = vpop.permute.xlu0 %30 }
  0x9a   :  { %vm32_vm1 = vcmp.eq.s32.totalorder %v28_v8, %v31_v9 }
  0x9b   :  { %v33_v11 = vsel %vm32_vm1, %v12_v0, 0.0 }
  0x9c   :  { %v34_v13 = vsel %vm14_vm0, %v33_v11, 0.0 }
  0xa0   :  { %v90_v10 = vpop.eup %89 }
  0xa1   :  { %v21_v12 = vsel %vm14_vm0, %v90_v10, 0.0 }
  0xa2   :  { %22 = vadd.xlane.f32.xlu1 %v21_v12 }
  0xa6   :  { %35 = vadd.xlane.f32.xlu1 %v34_v13 }
  0xaa   :  { %38 = vadd.xlane.f32.xlu1 %v37_v14 }
 0x12f   :  { %v23_v15 = vpop.xlane.xlu1 %22 }
 0x130   :  { %91 = vlog2.f32 %v23_v15 }
 0x133   :  { %v36_v16 = vpop.xlane.xlu1 %35 }
 0x137   :  { %v39_v20 = vpop.xlane.xlu1 %38 }
 0x13a   :  { %v92_v17 = vpop.eup %91 }
 0x13b   :  { %v25_v18 = vmul.f32 0.6931472, %v92_v17 }
 0x13d   :  { %v26_v19 = vadd.f32 %v25_v18, %v17_v4 }
 0x13f   :  { %v40_v21 = vsub.f32 %v36_v16, %v26_v19  ;;  %v41_v22 = vmul.f32 4.0, %v26_v19 }
 0x141   :  { %v42_v23 = vsub.f32 %v39_v20, %v41_v22  ;;  %v46_v24 = vmul.f32 0.9, %v40_v21 }
 0x143   :  { %v47_v25 = vmul.f32 0.025, %v42_v23 }
 0x145   :  { %v48_v26 = vadd.f32 %v47_v25, %v46_v24 }
 0x147   :  { %v49_v29 = vsub.f32 0.0, %v48_v26 }
 0x149   :  { %v50_v30 = vmul.f32 %v82_v28, %v49_v29 }
 0x14b   :  { %v52_v31 = vsel %vm51_vm3, %v50_v30, 0.0 }
 0x14c   :  { %53 = vadd.xlane.f32.xlu1 %v52_v31 }
 0x1d9   :  { %v54_v32 = vpop.xlane.xlu1 %53 }
 0x1da   :  { %v55_v33 = vrot.slane %v54_v32, 4 }
 0x1dc   :  { %v56_v34 = vadd.f32 %v55_v33, %v54_v32 }
 0x1de   :  { %v57_v35 = vrot.slane %v56_v34, 2 }
 0x1e0   :  { %v58_v36 = vadd.f32 %v57_v35, %v56_v34 }
 0x1e2   :  { %v59_v37 = vrot.slane %v58_v36, 1 }
 0x1e4   :  { %v60_v38 = vadd.f32 %v59_v37, %v58_v36 }
 0x1e6   :  { %83 = vpush %v60_v38 }
 0x217   :  { %s84_s13 = spop %83 }
 0x218   :  { %s64_s14 = smul.f32 0.5, %s84_s13 }
 0x21a   :  { %v65_v39 = vstv %s64_s14 }
 0x21b   :  { %67 = vst [vmem:[#allocation2] sm:$0xff] %v65_v39 }
 0x21c   :  { %104 = shalt.err (!%p101_p4)
}
 0x21d   :  { %s105_s18 = scalar_lea.hbm %s159_s2, 128 }
 0x21e   :  { %p106_p5 = scmp.ne.s32.totalorder %s159_s2, %s105_s18  ;;  %p109_p6 = scmp.lt.u32.totalorder %s105_s18, %s159_s2 }
 0x220   :  { %p111_p7 = pnand %p109_p6, %p106_p5 }
 0x222   :  { %114 = shalt.err (!%p111_p7)
}
 0x223   :  { %77 = dma.vmem_to_hbm [thread:$0]  %s75_s1, 128, %s159_s2, [#allocation3]  }
 0x224   :  { %115 = dma.done.wait [#allocation3], 128  }
 0x225   :  { %116 = vsyncadd [#allocation3], 4294967168 }
 0x226   :  { %81 = vsyncpa [#allocation3], 1 }

</bundles_post_ra>
